<compile_context>
chip_gen: v5e
topology: v5e:2x2
jax: 0.10.0
libtpu: 0.0.40
codegen_flags: <defaults>
</compile_context>

<pallas_src>
import jax
import jax.numpy as jnp
from jax.experimental import pallas as pl
from jax.experimental.pallas import tpu as pltpu

# ---------------- problem sizes (small demo, consistent with Energy defaults) -----------
B = 2            # batch
CIN = 3          # n_ch
H = W = 16       # im_sz (demo size; module default is 224 -> raise TR, same structure)
K = 3            # conv kernel
CMID = 32        # hidden conv channels
NCLS = 7         # n_classes (Energy default)

HW = H * W                    # 256 spatial positions per image
KKC = K * K * CIN             # 27 raw patch features
BLK = 32                      # per-position lane block: 27 patch + 1 bias-one + 4 zero pad
POS_PACK = 4                  # spatial positions packed per 128-lane row
LANES = POS_PACK * BLK        # 128 (lane-dense)
RPI = HW // POS_PACK          # 64 packed rows per image
TR = 32                       # packed rows per grid tile (multiple of 8, divides RPI)
T = RPI // TR                 # row tiles per image (2 here, exercises the accumulator path)
NCLS_PAD = 128                # lane-padded logits (sliced back to 7 outside)

assert HW % POS_PACK == 0 and RPI % TR == 0 and TR % 8 == 0
assert CMID == BLK


# ---------------- Pallas kernel ----------------------------------------------------------
def energy_classify_kernel(patch_ref, w1_ref, w2_ref, b2_ref, out_ref, acc_ref):
    """One (batch b, row-tile t) step:
       conv as block-diag matmul (bias folded) -> ReLU -> partial pooled-sum accumulate;
       on the last tile: lane-block sum + mean (folded into w2) + head matmul + bias."""
    t = pl.program_id(1)

    @pl.when(t == 0)
    def _init():
        acc_ref[...] = jnp.zeros_like(acc_ref)

    p = patch_ref[...]                                                    # (TR, 128) bf16
    # 3x3 conv for 4 packed positions at once: 128-deep MXU contraction, f32 accumulate.
    h = jnp.dot(p, w1_ref[...], preferred_element_type=jnp.float32)      # (TR, 128) f32
    h = jnp.maximum(h, 0.0)                                               # ReLU (VPU)

    # Per-tile partial pooling: a handful of (8,128) vreg adds on the VPU (keeps the XLU
    # free, no big reshape/copy of h).
    part = h[0:8, :]
    for r in range(8, TR, 8):
        part = part + h[r:r + 8, :]
    acc_ref[...] += part                                                  # (8, 128) f32

    @pl.when(t == pl.num_programs(1) - 1)
    def _finalize():
        pooled = jnp.sum(acc_ref[...], axis=0, keepdims=True)            # (1, 128) raw sum
        # Head matmul: w2 is stacked 4x (sums the 4 lane blocks) and pre-scaled by 1/HW.
        logits = jnp.dot(pooled, w2_ref[...],
                         preferred_element_type=jnp.float32)             # (1, NCLS_PAD)
        out_ref[...] = logits + b2_ref[...]                              # head bias add


def energy_forward(patches, w1_k, w2_k, b2_pad):
    """patches: (B, RPI, 128) bf16 -> padded logits (B, 1, NCLS_PAD) f32."""
    return pl.pallas_call(
        energy_classify_kernel,
        out_shape=jax.ShapeDtypeStruct((B, 1, NCLS_PAD), jnp.float32),
        grid_spec=pltpu.PrefetchScalarGridSpec(
            num_scalar_prefetch=0,
            grid=(B, T),
            in_specs=[
                pl.BlockSpec((None, TR, LANES), lambda b, t: (b, t, 0)),   # patch tile
                pl.BlockSpec((LANES, LANES), lambda b, t: (0, 0)),         # block-diag W1 (bf16)
                pl.BlockSpec((LANES, NCLS_PAD), lambda b, t: (0, 0)),      # stacked/scaled W2
                pl.BlockSpec((1, NCLS_PAD), lambda b, t: (0, 0)),          # head bias row
            ],
            out_specs=pl.BlockSpec((None, 1, NCLS_PAD), lambda b, t: (b, 0, 0)),
            scratch_shapes=[pltpu.VMEM((8, LANES), jnp.float32)],          # pooled-sum acc
        ),
        compiler_params=pltpu.CompilerParams(
            # batch axis shards across v7x's 2 TensorCores; row-tile axis accumulates.
            dimension_semantics=("parallel", "arbitrary"),
            # above v5e's 16 MiB scoped default; safe on v6e/v7x (tile sizes stay far below).
            vmem_limit_bytes=32 * 1024 * 1024,
        ),
    )(patches, w1_k, w2_k, b2_pad)


# ---------------- glue: im2col + parameter packing (plain JAX, layout only) --------------
def im2col_same_3x3(x_nhwc):
    """(B, H, W, C) -> (B, H*W, 9*C) patches for a stride-1, pad-1 3x3 conv.
    Patch feature order is (kh, kw, cin); the synthetic conv weights use the same order."""
    b, h, w, c = x_nhwc.shape
    xp = jnp.pad(x_nhwc, ((0, 0), (1, 1), (1, 1), (0, 0)))
    cols = []
    for di in range(K):
        for dj in range(K):
            cols.append(xp[:, di:di + h, dj:dj + w, :])
    return jnp.concatenate(cols, axis=-1).reshape(b, h * w, K * K * c)


def pack_params(w1_raw, b1_raw, w2_raw, b2_raw):
    """Block-diagonal bf16 W1 (conv bias folded, 4 copies), 4x-stacked f32 W2 (x 1/HW),
    and the padded head bias row."""
    blk = jnp.zeros((BLK, CMID), jnp.float32)
    blk = blk.at[:KKC, :].set(w1_raw)
    blk = blk.at[KKC, :].set(b1_raw)                 # conv-bias row, hit by the ones column

    w1_k = jnp.zeros((LANES, LANES), jnp.float32)
    w2_k = jnp.zeros((LANES, NCLS_PAD), jnp.float32)
    for p in range(POS_PACK):
        w1_k = w1_k.at[p * BLK:(p + 1) * BLK, p * CMID:(p + 1) * CMID].set(blk)
        w2_k = w2_k.at[p * CMID:(p + 1) * CMID, :NCLS].set(w2_raw * (1.0 / HW))

    b2_pad = jnp.zeros((1, NCLS_PAD), jnp.float32).at[0, :NCLS].set(b2_raw)
    # w2_k / b2_pad stay f32: they are tiny (no HBM win) and keep the head full precision.
    return w1_k.astype(jnp.bfloat16), w2_k, b2_pad


@jax.jit
def energy_module_forward(x_nchw, w1_raw, b1_raw, w2_raw, b2_raw):
    """Equivalent of Energy.forward(x): backbone logits (B, NCLS)."""
    x_nhwc = jnp.transpose(x_nchw, (0, 2, 3, 1)).astype(jnp.bfloat16)
    patches = im2col_same_3x3(x_nhwc)                                   # (B, HW, 27) bf16
    ones = jnp.ones((B, HW, 1), jnp.bfloat16)                           # conv-bias column
    patches = jnp.concatenate([patches, ones], axis=-1)                 # (B, HW, 28)
    patches = jnp.pad(patches, ((0, 0), (0, 0), (0, BLK - (KKC + 1))))  # (B, HW, 32)
    patches = patches.reshape(B, RPI, LANES)                            # 4 positions / row
    w1_k, w2_k, b2_pad = pack_params(w1_raw, b1_raw, w2_raw, b2_raw)
    logits_pad = energy_forward(patches, w1_k, w2_k, b2_pad)            # (B, 1, NCLS_PAD)
    return logits_pad[:, 0, :NCLS]


if __name__ == "__main__":
    key = jax.random.PRNGKey(0)
    kx, k1, kb1, k2, kb2 = jax.random.split(key, 5)

    # Deterministic synthetic input (NCHW like PyTorch) and raw backbone parameters.
    x = jax.random.uniform(kx, (B, CIN, H, W), jnp.float32, minval=-1.0, maxval=1.0)
    w1_raw = jax.random.normal(k1, (KKC, CMID), jnp.float32) * 0.1   # conv weight (im2col form)
    b1_raw = jax.random.normal(kb1, (CMID,), jnp.float32) * 0.1      # conv bias
    w2_raw = jax.random.normal(k2, (CMID, NCLS), jnp.float32) * 0.1  # head weight
    b2_raw = jax.random.normal(kb2, (NCLS,), jnp.float32) * 0.1      # head bias

    logits = energy_module_forward(x, w1_raw, b1_raw, w2_raw, b2_raw)
    jax.block_until_ready(logits)

    # Pure-JAX reference with the SAME bf16 quantization of activations / conv weights
    # (accumulation in f32, HIGHEST precision so the reference matmul does not re-quantize).
    x_ref = jnp.transpose(x, (0, 2, 3, 1)).astype(jnp.bfloat16).astype(jnp.float32)
    patches_ref = im2col_same_3x3(x_ref)                                    # (B, HW, 27)
    w1_b = w1_raw.astype(jnp.bfloat16).astype(jnp.float32)
    b1_b = b1_raw.astype(jnp.bfloat16).astype(jnp.float32)
    h_ref = jnp.maximum(
        jnp.einsum("bpk,kc->bpc", patches_ref, w1_b,
                   precision=jax.lax.Precision.HIGHEST) + b1_b, 0.0)
    pooled_ref = h_ref.mean(axis=1)                                         # (B, CMID)
    logits_ref = jnp.dot(pooled_ref, w2_raw,
                         precision=jax.lax.Precision.HIGHEST) + b2_raw      # (B, NCLS)

    assert logits.shape == (B, NCLS)
    err = float(jnp.max(jnp.abs(logits - logits_ref)))
    assert jnp.allclose(logits, logits_ref, atol=1e-3, rtol=1e-3), err

    print("KERNEL_OK")
</pallas_src>

<mosaic_0001>
module attributes {stable_mosaic.version = 11 : i64} {
  func.func @energy_classify_kernel(%arg0: i32, %arg1: i32, %arg2: memref<1x32x128xbf16, #tpu.memory_space<vmem>>, %arg3: memref<128x128xbf16, #tpu.memory_space<vmem>>, %arg4: memref<128x128xf32, #tpu.memory_space<vmem>>, %arg5: memref<1x128xf32, #tpu.memory_space<vmem>>, %arg6: memref<1x1x128xf32, #tpu.memory_space<vmem>>, %arg7: memref<8x128xf32, #tpu.memory_space<vmem>>) attributes {dimension_semantics = [#tpu.dimension_semantics<parallel>, #tpu.dimension_semantics<arbitrary>], iteration_bounds = array<i64: 2, 2>, scalar_prefetch = 0 : i64, scratch_operands = 1 : i64, tpu.core_type = #tpu.core_type<tc>, window_params = [{transform_indices = @transform_0, window_bounds = array<i64: 1, 32, 128>}, {pipeline_mode = #tpu.pipeline_mode<synchronous>, transform_indices = @transform_1, window_bounds = array<i64: 128, 128>}, {pipeline_mode = #tpu.pipeline_mode<synchronous>, transform_indices = @transform_2, window_bounds = array<i64: 128, 128>}, {pipeline_mode = #tpu.pipeline_mode<synchronous>, transform_indices = @transform_3, window_bounds = array<i64: 1, 128>}, {transform_indices = @transform_4, window_bounds = array<i64: 1, 1, 128>}]} {
    %c0_i32 = arith.constant 0 : i32
    %0 = arith.cmpi eq, %arg1, %c0_i32 : i32
    %1 = arith.extui %0 : i1 to i32
    %c0_i32_0 = arith.constant 0 : i32
    %2 = arith.cmpi ne, %1, %c0_i32_0 : i32
    scf.if %2 {
      %cst_11 = arith.constant 0.000000e+00 : f32
      %22 = vector.broadcast %cst_11 : f32 to vector<8x128xf32>
      %c0_12 = arith.constant 0 : index
      %c0_13 = arith.constant 0 : index
      %23 = vector.load %arg7[%c0_12, %c0_13] : memref<8x128xf32, #tpu.memory_space<vmem>>, vector<8x128xf32>
      tpu.vector_store %arg7[%c0_12, %c0_13], %22 {strides = array<i32>} : memref<8x128xf32, #tpu.memory_space<vmem>>, vector<8x128xf32>,
    } else {
    }
    %c0 = arith.constant 0 : index
    %c0_1 = arith.constant 0 : index
    %c0_2 = arith.constant 0 : index
    %3 = vector.load %arg2[%c0, %c0_1, %c0_2] : memref<1x32x128xbf16, #tpu.memory_space<vmem>>, vector<1x32x128xbf16>
    %4 = vector.shape_cast %3 : vector<1x32x128xbf16> to vector<32x128xbf16>
    %c0_3 = arith.constant 0 : index
    %c0_4 = arith.constant 0 : index
    %5 = vector.load %arg3[%c0_3, %c0_4] : memref<128x128xbf16, #tpu.memory_space<vmem>>, vector<128x128xbf16>
    %cst = arith.constant dense<0.000000e+00> : vector<32x128xf32>
    %6 = tpu.matmul %4, %5, %cst {dimension_numbers = #tpu.dot_dimension_numbers<[1], [0], [0], [1], [0, 0, 1, 1], [], []>} : vector<32x128xbf16>, vector<128x128xbf16>, vector<32x128xf32> -> vector<32x128xf32>
    %cst_5 = arith.constant 0.000000e+00 : f32
    %7 = vector.broadcast %cst_5 : f32 to vector<32x128xf32>
    %8 = arith.maximumf %6, %7 : vector<32x128xf32>
    %9 = vector.extract_strided_slice %8 {offsets = [0, 0], sizes = [8, 128], strides = [1, 1]} : vector<32x128xf32> to vector<8x128xf32>
    %10 = vector.extract_strided_slice %8 {offsets = [8, 0], sizes = [8, 128], strides = [1, 1]} : vector<32x128xf32> to vector<8x128xf32>
    %11 = arith.addf %9, %10 : vector<8x128xf32>
    %12 = vector.extract_strided_slice %8 {offsets = [16, 0], sizes = [8, 128], strides = [1, 1]} : vector<32x128xf32> to vector<8x128xf32>
    %13 = arith.addf %11, %12 : vector<8x128xf32>
    %14 = vector.extract_strided_slice %8 {offsets = [24, 0], sizes = [8, 128], strides = [1, 1]} : vector<32x128xf32> to vector<8x128xf32>
    %15 = arith.addf %13, %14 : vector<8x128xf32>
    %c0_6 = arith.constant 0 : index
    %c0_7 = arith.constant 0 : index
    %16 = vector.load %arg7[%c0_6, %c0_7] : memref<8x128xf32, #tpu.memory_space<vmem>>, vector<8x128xf32>
    %17 = arith.addf %16, %15 : vector<8x128xf32>
    %c0_8 = arith.constant 0 : index
    %c0_9 = arith.constant 0 : index
    %18 = vector.load %arg7[%c0_8, %c0_9] : memref<8x128xf32, #tpu.memory_space<vmem>>, vector<8x128xf32>
    tpu.vector_store %arg7[%c0_8, %c0_9], %17 {strides = array<i32>} : memref<8x128xf32, #tpu.memory_space<vmem>>, vector<8x128xf32>,
    %c1_i32 = arith.constant 1 : i32
    %19 = arith.cmpi eq, %arg1, %c1_i32 : i32
    %20 = arith.extui %19 : i1 to i32
    %c0_i32_10 = arith.constant 0 : i32
    %21 = arith.cmpi ne, %20, %c0_i32_10 : i32
    scf.if %21 {
      %c0_11 = arith.constant 0 : index
      %c0_12 = arith.constant 0 : index
      %22 = vector.load %arg7[%c0_11, %c0_12] : memref<8x128xf32, #tpu.memory_space<vmem>>, vector<8x128xf32>
      %cst_13 = arith.constant dense<0.000000e+00> : vector<128xf32>
      %23 = vector.multi_reduction <add>, %22, %cst_13 [0] : vector<8x128xf32> to vector<128xf32>
      %24 = vector.shape_cast %23 : vector<128xf32> to vector<1x128xf32>
      %c0_14 = arith.constant 0 : index
      %c0_15 = arith.constant 0 : index
      %25 = vector.load %arg4[%c0_14, %c0_15] : memref<128x128xf32, #tpu.memory_space<vmem>>, vector<128x128xf32>
      %cst_16 = arith.constant dense<0.000000e+00> : vector<1x128xf32>
      %26 = tpu.matmul %24, %25, %cst_16 {dimension_numbers = #tpu.dot_dimension_numbers<[1], [0], [0], [1], [0, 0, 1, 1], [], []>} : vector<1x128xf32>, vector<128x128xf32>, vector<1x128xf32> -> vector<1x128xf32>
      %c0_17 = arith.constant 0 : index
      %c0_18 = arith.constant 0 : index
      %27 = vector.load %arg5[%c0_17, %c0_18] : memref<1x128xf32, #tpu.memory_space<vmem>>, vector<1x128xf32>
      %28 = arith.addf %26, %27 : vector<1x128xf32>
      %c0_19 = arith.constant 0 : index
      %c0_20 = arith.constant 0 : index
      %c0_21 = arith.constant 0 : index
      %29 = vector.load %arg6[%c0_19, %c0_20, %c0_21] : memref<1x1x128xf32, #tpu.memory_space<vmem>>, vector<1x1x128xf32>
      %30 = vector.shape_cast %29 : vector<1x1x128xf32> to vector<1x128xf32>
      %31 = vector.shape_cast %28 : vector<1x128xf32> to vector<1x1x128xf32>
      tpu.vector_store %arg6[%c0_19, %c0_20, %c0_21], %31 {strides = array<i32>} : memref<1x1x128xf32, #tpu.memory_space<vmem>>, vector<1x1x128xf32>,
    } else {
    }
    return
  }
  func.func @transform_0(%arg0: i32, %arg1: i32) -> (i32, i32, i32) {
    %c0_i32 = arith.constant 0 : i32
    %c0_i32_0 = arith.constant 0 : i32
    return %arg0, %arg1, %c0_i32 : i32, i32, i32
  }
  func.func @transform_1(%arg0: i32, %arg1: i32) -> (i32, i32) {
    %c0_i32 = arith.constant 0 : i32
    %c0_i32_0 = arith.constant 0 : i32
    %c0_i32_1 = arith.constant 0 : i32
    return %c0_i32, %c0_i32_0 : i32, i32
  }
  func.func @transform_2(%arg0: i32, %arg1: i32) -> (i32, i32) {
    %c0_i32 = arith.constant 0 : i32
    %c0_i32_0 = arith.constant 0 : i32
    %c0_i32_1 = arith.constant 0 : i32
    return %c0_i32, %c0_i32_0 : i32, i32
  }
  func.func @transform_3(%arg0: i32, %arg1: i32) -> (i32, i32) {
    %c0_i32 = arith.constant 0 : i32
    %c0_i32_0 = arith.constant 0 : i32
    %c0_i32_1 = arith.constant 0 : i32
    return %c0_i32, %c0_i32_0 : i32, i32
  }
  func.func @transform_4(%arg0: i32, %arg1: i32) -> (i32, i32, i32) {
    %c0_i32 = arith.constant 0 : i32
    %c0_i32_0 = arith.constant 0 : i32
    %c0_i32_1 = arith.constant 0 : i32
    return %arg0, %c0_i32, %c0_i32_0 : i32, i32, i32
  }
}

</mosaic_0001>

<bundles_post_ra>
// kernel: energy_module_forward.1
= control target key start
LH: loop header
LB: loop body
LE: loop exit
PB: predicated region body
PF: predicated region fallthrough
CT: control target
= control target key end

     0   :  { %9 = vsyncpa [#allocation4], 0  ;;  %s938_s0 = inlined_call_operand.vmem [shape: bf16[2,64,128], index: 0, kind: input, shape index: {}]   ;;  %s939_s1 = inlined_call_operand.vmem [shape: bf16[128,128], index: 1, kind: input, shape index: {}]   ;;  %s940_s2 = inlined_call_operand.vmem [shape: f32[128,128], index: 2, kind: input, shape index: {}]   ;;  %s941_s3 = inlined_call_operand.vmem [shape: f32[1,128], index: 3, kind: input, shape index: {}]   ;;  %s942_s4 = inlined_call_operand.hbm [shape: f32[2,1,128], index: 4, kind: output, shape index: {}]  }
   0x1   :  { %11 = vsyncpa [#allocation4 + $0x1], 0  ;;  %s735_s15 = smov 0   ;;  %s737_s16 = smov 0  }
   0x2   :  { %s739_s17 = smov 0   ;;  %s741_s18 = smov 0  }
   0x3   :  { %s743_s19 = smov 0   ;;  %s745_s20 = smov 0  }
   0x4   :  { %s747_s21 = smov 0   ;;  %s749_s22 = smov 0  }
   0x5 LB: > { %s471_s23 = sadd.s32 4294967295, %s707_s22   ;;  %s472_s24 = sadd.s32 4294967294, %s707_s22   ;;  %s707_s22 = sphi %s749_s22, %s17_s22   ;;  %s703_s21 = sphi %s747_s21, %s951_s21   ;;  %s699_s20 = sphi %s745_s20, %s950_s20   ;;  %s695_s19 = sphi %s743_s19, %s949_s19   ;;  %s691_s18 = sphi %s741_s18, %s948_s18   ;;  %s687_s17 = sphi %s739_s17, %s947_s17   ;;  %s683_s16 = sphi %s737_s16, %s946_s16   ;;  %s679_s15 = sphi %s735_s15, %s945_s15  }
   0x6   : > { %s26_s25 = sadd.s32 1, %s699_s20  ;;  %s29_s26 = sadd.s32 1, %s703_s21 }
   0x7   : > { %p27_p0 = scmp.ge.s32.totalorder %s26_s25, 2  ;;  %p137_p1 = scmp.ne.s32.totalorder %s687_s17, %s683_s16 }
   0x8   : > { %p138_p2 = scmp.eq.s32.totalorder %s471_s23, 3  ;;  %p143_p4 = scmp.ne.s32.totalorder %s683_s16, %s679_s15 }
   0x9   : > { %s953_s25 = smov (%p27_p0, %s26_s25), 0  ;;  %s955_s26 = smov (!%p27_p0, %s29_s26), %s703_s21 }
   0xa   : > { %p784_p3 = por %p138_p2, %p137_p1  ;;  %p31_p5 = scmp.ge.s32.totalorder %s955_s26, 2 }
   0xb   : > { %p144_p6 = scmp.eq.s32.totalorder %s472_s24, 3  ;;  %p475_p7 = scmp.ge.s32.totalorder %s707_s22, 1 }
   0xc   : > { %p184_p8 = scmp.lt.s32.totalorder %s707_s22, 5  ;;  %s957_s26 = smov (%p31_p5, %s955_s26), 0 }
   0xd   : > { %p794_p9 = por %p144_p6, %p143_p4  ;;  %s124_s29 = ssub.s32 %s703_s21, %s957_s26 }
   0xe   : > { %p185_p10 = pnand %p475_p7, %p184_p8  ;;  %s127_s30 = sadd.s32 1, %s687_s17 }
   0xf   : > { %p125_p11 = scmp.eq.s32.totalorder %s124_s29, 0  ;;  %s211_s6 = sand.u32 (!%p185_p10), 1, %s683_s16  }
  0x10   : > { %188 = sbr.rel (%p185_p10) target bundleno = 381 (0x17d), region = 36  ;;  %s476_s7 = sshll.u32 (!%p185_p10), %s691_s18, 2 }
  0x11   : > { %s802_s5 = scalar_select %p125_p11, %s687_s17, %s127_s30  }
  0x12   : > { %p214_p12 = scmp.lt.s32.totalorder (!%p185_p10), %s695_s19, 1  ;;  %p216_p13 = scmp.lt.s32.totalorder (!%p185_p10), %s476_s7, 7 }
  0x13   : > { %s813_s23 = scalar_lea.vmem (!%p185_p10), [#allocation3], %s211_s6  ;;  %p479_p0 = scmp.ne.s32.totalorder (!%p185_p10), %s691_s18, 0 }
  0x15   : > { %s215_s8 = scalar_select %p214_p12, %s695_s19, 1 }
  0x16   : > { %s959_s7 = smov (!%p216_p13, %s476_s7), 7  ;;  %226 = sbr.rel (%p479_p0) target bundleno = 29 (0x1d), region = 40 }
  0x17   : > { %s477_s9 = sshll.u32 %s215_s8, 3 }
  0x18   : > { %s219_s10 = sadd.s32 %s477_s9, %s959_s7 }
  0x19   : > { %s478_s11 = sshll.u32 %s219_s10, 2 }
  0x1a   : > { %s221_s14 = scalar_lea.vmem %s938_s0, %s478_s11 }
  0x1b   : > { %v709_v0 = vmov 0.0  }
  0x1c   : > { %227 = vst [vmem:[#allocation2] sm:$0xff] %v709_v0 }
  0x1d PF: > { %v532_v1 = vld [vmem:[%s939_s1 + $0x38] sm:$0xff]  ;;  %v531_v2 = vld [vmem:[%s939_s1 + $0x30] sm:$0xff]  ;;  %v530_v3 = vld [vmem:[%s939_s1 + $0x28] sm:$0xff]  ;;  %p520_p1 = scmp.ne.s32.totalorder %s691_s18, 1 }
  0x1e   : > { %308 = vmatpush.bf16.msra.mxu0 %v532_v1  ;;  %533 = vmatpush.bf16.msra.mxu1 %v532_v1  ;;  %v529_v4 = vld [vmem:[%s939_s1 + $0x20] sm:$0xff]  ;;  %v528_v5 = vld [vmem:[%s939_s1 + $0x18] sm:$0xff]  ;;  %v527_v6 = vld [vmem:[%s939_s1 + $0x10] sm:$0xff] }
  0x1f   : > { %v526_v7 = vld [vmem:[%s939_s1 + $0x8] sm:$0xff]  ;;  %v525_v8 = vld [vmem:[%s939_s1] sm:$0xff] }
  0x20   : > { %v523_v9 = vld [vmem:[%s221_s14] sm:$0xff]  ;;  %v524_v10 = vld [vmem:[%s221_s14 + $0x8] sm:$0xff] }
  0x22   : > { %309 = vmatpush.bf16.msra.mxu0 %v531_v2  ;;  %534 = vmatpush.bf16.msra.mxu1 %v531_v2 }
  0x23   : > { %v334_v21 = vld [vmem:[#allocation2] sm:$0xff] }
  0x26   : > { %310 = vmatpush.bf16.msra.mxu0 %v530_v3  ;;  %535 = vmatpush.bf16.msra.mxu1 %v530_v3 }
  0x2a   : > { %311 = vmatpush.bf16.msra.mxu0 %v529_v4  ;;  %536 = vmatpush.bf16.msra.mxu1 %v529_v4 }
  0x2e   : > { %312 = vmatpush.bf16.msra.mxu0 %v528_v5  ;;  %537 = vmatpush.bf16.msra.mxu1 %v528_v5 }
  0x32   : > { %313 = vmatpush.bf16.msra.mxu0 %v527_v6  ;;  %538 = vmatpush.bf16.msra.mxu1 %v527_v6 }
  0x36   : > { %314 = vmatpush.bf16.msra.mxu0 %v526_v7  ;;  %539 = vmatpush.bf16.msra.mxu1 %v526_v7 }
  0x3a   : > { %315 = vmatpush.bf16.msra.mxu0 %v525_v8  ;;  %540 = vmatpush.bf16.msra.mxu1 %v525_v8 }
  0x3d   : > { %316 = vmatmul.bf16.vlgmr.msra.gmra.mxu0 %v523_v9  ;;  %321 = vmatmul.bf16.vlgmr.msra.gmra.mxu1 %v524_v10 }
  0xba   : > { %v317_v11 = vpop.f32.mrf.mxu0  ;;  %v322_v12 = vpop.f32.mrf.mxu1 }
  0xbb   : > { %v327_v14 = vmax.f32 %v317_v11, 0.0  ;;  %v329_v17 = vmax.f32 %v322_v12, 0.0 }
  0xc2   : > { %v319_v13 = vpop.f32.mrf.mxu0  ;;  %v324_v16 = vpop.f32.mrf.mxu1 }
  0xc3   : > { %v328_v15 = vmax.f32 %v319_v13, 0.0  ;;  %v330_v19 = vmax.f32 %v324_v16, 0.0 }
  0xc5   : > { %v331_v18 = vadd.f32 %v328_v15, %v327_v14 }
  0xc7   : > { %v332_v20 = vadd.f32 %v331_v18, %v329_v17 }
  0xc9   : > { %v333_v22 = vadd.f32 %v332_v20, %v330_v19  ;;  %340 = sbr.rel (%p520_p1) target bundleno = 367 (0x16f), region = 44 }
  0xcb   : > { %v335_v23 = vadd.f32 %v334_v21, %v333_v22 }
  0xcd   : > { %336 = vst [vmem:[#allocation2] sm:$0xff] %v335_v23 }
  0xce   : > { %v363_v24 = vld [vmem:[%s940_s2 + $0x78] sm:$0xff]  ;;  %v362_v25 = vld [vmem:[%s940_s2 + $0x70] sm:$0xff]  ;;  %v361_v26 = vld [vmem:[%s940_s2 + $0x68] sm:$0xff] }
  0xcf   : > { %365 = vmatpush.msra.mxu0 %v363_v24  ;;  %v360_v27 = vld [vmem:[%s940_s2 + $0x60] sm:$0xff]  ;;  %v359_v29 = vld [vmem:[%s940_s2 + $0x58] sm:$0xff]  ;;  %v358_v30 = vld [vmem:[%s940_s2 + $0x50] sm:$0xff] }
  0xd0   : > { %v357_v32 = vld [vmem:[%s940_s2 + $0x48] sm:$0xff]  ;;  %v356_v33 = vld [vmem:[%s940_s2 + $0x40] sm:$0xff]  ;;  %v355_v35 = vld [vmem:[%s940_s2 + $0x38] sm:$0xff] }
  0xd1   : > { %366 = vmatpush.msra.mxu0 %v362_v25  ;;  %v354_v36 = vld [vmem:[%s940_s2 + $0x30] sm:$0xff]  ;;  %v353_v38 = vld [vmem:[%s940_s2 + $0x28] sm:$0xff]  ;;  %v352_v39 = vld [vmem:[%s940_s2 + $0x20] sm:$0xff] }
  0xd2   : > { %v351_v41 = vld [vmem:[%s940_s2 + $0x18] sm:$0xff]  ;;  %v350_v42 = vld [vmem:[%s940_s2 + $0x10] sm:$0xff]  ;;  %v349_v44 = vld [vmem:[%s940_s2 + $0x8] sm:$0xff] }
  0xd3   : > { %367 = vmatpush.msra.mxu0 %v361_v26  ;;  %v348_v45 = vld [vmem:[%s940_s2] sm:$0xff] }
  0xd4   : > { %v341_v28 = vld [vmem:[#allocation2] sm:$0xff] }
  0xd5   : > { %368 = vmatpush.msra.mxu0 %v360_v27  ;;  %v342_v31 = vrot.slane %v341_v28, 4  ;;  %v364_v47 = vld [vmem:[%s941_s3] sm:$0x1] }
  0xd7   : > { %369 = vmatpush.msra.mxu0 %v359_v29  ;;  %v343_v34 = vadd.f32 %v342_v31, %v341_v28 }
  0xd9   : > { %370 = vmatpush.msra.mxu0 %v358_v30  ;;  %v344_v37 = vrot.slane %v343_v34, 2 }
  0xdb   : > { %371 = vmatpush.msra.mxu0 %v357_v32  ;;  %v345_v40 = vadd.f32 %v344_v37, %v343_v34 }
  0xdd   : > { %372 = vmatpush.msra.mxu0 %v356_v33  ;;  %v346_v43 = vrot.slane %v345_v40, 1 }
  0xdf   : > { %373 = vmatpush.msra.mxu0 %v355_v35  ;;  %v347_v46 = vadd.f32 %v346_v43, %v345_v40 }
  0xe1   : > { %374 = vmatpush.msra.mxu0 %v354_v36 }
  0xe3   : > { %375 = vmatpush.msra.mxu0 %v353_v38 }
  0xe5   : > { %376 = vmatpush.msra.mxu0 %v352_v39 }
  0xe7   : > { %377 = vmatpush.msra.mxu0 %v351_v41 }
  0xe9   : > { %378 = vmatpush.msra.mxu0 %v350_v42 }
  0xeb   : > { %379 = vmatpush.msra.mxu0 %v349_v44 }
  0xed   : > { %380 = vmatpush.msra.mxu0 %v348_v45 }
  0xee   : > { %381 = vmatmul.f32.vlgmr.msra.gmra.mxu0 %v347_v46 }
 0x16b   : > { %v382_v48 = vpop.f32.mrf.mxu0 }
 0x16c   : > { %v383_v49 = vadd.f32 %v382_v48, %v364_v47 }
 0x16e   : > { %385 = vst [vmem:[%s813_s23] sm:$0x1] %v383_v49 }
 0x16f PF: > { %s395_s14 = scalar_lea.hbm %s942_s4, %s695_s19  ;;  %s397_s10 = sshll.u32 %s813_s23, 4  ;;  %s398_s10 = int_to_ptr.vmem [resolvable:$true] %s397_s10 }
 0x170   : > { %s399_s11 = sshll.u32 %s395_s14, 4  ;;  %s387_s12 = scalar_lea.sflag [#allocation4], %s211_s6  ;;  %s400_s11 = int_to_ptr.hbm [resolvable:$true] %s399_s11 }
 0x171   : > { %s627_s13 = sshra.s32 %s400_s11, 4  ;;  %s633_s18 = scalar_lea.hbm %s942_s4, 2  ;;  %s628_s13 = int_to_ptr.hbm [resolvable:$true] %s627_s13 }
 0x172   : > { %s629_s24 = scalar_lea.hbm %s628_s13, 1  ;;  %p634_p6 = scmp.lt.s32.totalorder %s628_s13, %s942_s4 }
 0x173   : > { %p630_p2 = scmp.ne.s32.totalorder %s628_s13, %s629_s24  ;;  %p635_p7 = scmp.lt.s32.totalorder %s633_s18, %s629_s24 }
 0x175   : > { %p631_p4 = pnand %p630_p2, %p784_p3  ;;  %p636_p8 = por %p635_p7, %p634_p6 }
 0x177   : > { %p632_p5 = pneg %p631_p4 }
 0x179   : > { %p637_p10 = pnand %p636_p8, %p632_p5 }
 0x17b   : > { %640 = shalt.err (!%p637_p10)
}
 0x17c   : > { %541 = dma.vmem_to_hbm [thread:$0]  (%p784_p3), %s398_s10, 16, %s400_s11, %s387_s12  }
 0x17d PF: > { %p547_p11 = scmp.ge.s32.totalorder %s707_s22, 2  ;;  %s411_s19 = sand.u32 1, %s679_s15  }
 0x17e   : > { %s412_s6 = scalar_lea.sflag [#allocation4], %s411_s19 }
 0x17f   : > { %p544_p12 = pnand %p547_p11, %p794_p9 }
 0x181   : > { %p545_p13 = pneg %p544_p12 }
 0x183   : > { %674 = dma.done.wait (%p545_p13), %s412_s6, 16  }
 0x184   : > { %676 = vsyncadd (%p545_p13), %s412_s6, 4294967280  ;;  %s17_s22 = sadd.s32 1, %s707_s22   ;;  %s945_s15 = smov %s683_s16 }
 0x185   : > { %p14_p0 = scmp.ge.s32.totalorder %s17_s22, 6   ;;  %s946_s16 = smov %s687_s17 }
 0x186   : > { %s947_s17 = smov %s802_s5  ;;  %s948_s18 = smov %s699_s20 }
 0x187   : > { %s949_s19 = smov %s703_s21  ;;  %s950_s20 = smov %s953_s25 }
 0x188   : > { %s951_s21 = smov %s957_s26  ;;  %16 = sbr.rel (!%p14_p0) target bundleno = 5 (0x5), region = 79 }
 0x18d   :  { %417 = vsyncpa [#allocation4], 1 }
 0x18e   :  { %419 = vsyncpa [#allocation4 + $0x1], 1 }

</bundles_post_ra>
